<compile_context>
chip_gen: v6e
topology: v6e:2x2x1
jax: 0.10.0
libtpu: 0.0.40
codegen_flags: <defaults>
</compile_context>

<pallas_src>
import functools

import jax
import jax.numpy as jnp
from jax.experimental import pallas as pl
from jax.experimental.pallas import tpu as pltpu


def _soft_dice_kernel(logits_ref, targets_ref, o_ref,
                      acc_inter, acc_probs, acc_tgts, acc_score,
                      *, inv_bs, smooth):
    b = pl.program_id(0)          # batch row
    r = pl.program_id(1)          # feature chunk (reduction axis)
    n_b = pl.num_programs(0)
    n_r = pl.num_programs(1)

    @pl.when(jnp.logical_and(b == 0, r == 0))
    def _init_all():
        acc_score[...] = jnp.zeros_like(acc_score)

    @pl.when(r == 0)
    def _init_batch():
        acc_inter[...] = jnp.zeros_like(acc_inter)
        acc_probs[...] = jnp.zeros_like(acc_probs)
        acc_tgts[...] = jnp.zeros_like(acc_tgts)

    x = logits_ref[...].astype(jnp.float32)    # (TR, C), lane/sublane dense
    t = targets_ref[...].astype(jnp.float32)   # (TR, C)

    # sigmoid(x) = 0.5 * tanh(0.5 * x) + 0.5  -- tanh on the EUP, saturating,
    # so the -1e4 feature padding yields exactly 0 and contributes nothing.
    probs = 0.5 * jnp.tanh(0.5 * x) + 0.5

    acc_inter[...] += jnp.sum(probs * t, keepdims=True)   # (1, 1)
    acc_probs[...] += jnp.sum(probs, keepdims=True)       # (1, 1)
    acc_tgts[...] += jnp.sum(t, keepdims=True)            # (1, 1)

    @pl.when(r == n_r - 1)
    def _finish_batch():
        score = (2.0 * (acc_inter[...] + smooth)
                 / (acc_probs[...] + acc_tgts[...] + smooth))   # (1, 1)
        acc_score[...] += score

    @pl.when(jnp.logical_and(b == n_b - 1, r == n_r - 1))
    def _finish_all():
        o_ref[...] = (1.0 - acc_score[...] * inv_bs).astype(o_ref.dtype)


def soft_dice_loss_pallas(logits, targets, *, smooth=1.0,
                          lane_block=512, row_block=1024):
    """Pallas implementation of SoftDiceLoss.forward -> scalar loss."""
    bs = logits.shape[0]
    m1 = logits.reshape(bs, -1)
    m2 = targets.reshape(bs, -1)
    if m2.dtype == jnp.bool_:
        m2 = m2.astype(jnp.float32)
    n_feat = m1.shape[1]

    # View each batch row's features as a (rows, C) slab: C lanes (multiple
    # of 128), rows tiled in TR-row chunks (TR a multiple of 8).
    C = lane_block
    rows = pl.cdiv(n_feat, C)
    if rows <= row_block:
        tr = pl.cdiv(rows, 8) * 8          # single chunk, rows rounded to 8
        n_chunks = 1
    else:
        tr = row_block
        n_chunks = pl.cdiv(rows, tr)
    r_pad = n_chunks * tr
    f_pad = r_pad * C

    if f_pad != n_feat:
        pad = f_pad - n_feat
        # tanh-sigmoid(-1e4) == 0 exactly; target pad == 0 -> no contribution.
        m1 = jnp.pad(m1, ((0, 0), (0, pad)), constant_values=-1e4)
        m2 = jnp.pad(m2, ((0, 0), (0, pad)), constant_values=0)
    m1 = m1.reshape(bs, r_pad, C)
    m2 = m2.reshape(bs, r_pad, C)

    kernel = functools.partial(_soft_dice_kernel,
                               inv_bs=1.0 / float(bs),
                               smooth=float(smooth))

    out = pl.pallas_call(
        kernel,
        out_shape=jax.ShapeDtypeStruct((1, 1), jnp.float32),
        grid=(bs, n_chunks),
        in_specs=[
            pl.BlockSpec((None, tr, C), lambda b, r: (b, r, 0)),
            pl.BlockSpec((None, tr, C), lambda b, r: (b, r, 0)),
        ],
        out_specs=pl.BlockSpec((1, 1), lambda b, r: (0, 0)),
        scratch_shapes=[
            pltpu.VMEM((1, 1), jnp.float32),   # sum(probs * targets)  (per batch)
            pltpu.VMEM((1, 1), jnp.float32),   # sum(probs)            (per batch)
            pltpu.VMEM((1, 1), jnp.float32),   # sum(targets)          (per batch)
            pltpu.VMEM((1, 1), jnp.float32),   # running sum of scores
        ],
        compiler_params=pltpu.CompilerParams(
            dimension_semantics=("arbitrary", "arbitrary")),
    )(m1, m2)
    return out[0, 0]


def soft_dice_loss_ref(logits, targets, smooth=1.0):
    """Pure-JAX reference mirroring the PyTorch forward."""
    bs = logits.shape[0]
    probs = jax.nn.sigmoid(logits)
    m1 = probs.reshape(bs, -1)
    m2 = targets.reshape(bs, -1).astype(probs.dtype)
    intersection = m1 * m2
    score = (2.0 * (intersection.sum(axis=1) + smooth)
             / (m1.sum(axis=1) + m2.sum(axis=1) + smooth))
    return 1.0 - score.sum() / bs


if __name__ == "__main__":
    key = jax.random.PRNGKey(0)
    k1, k2, k3, k4 = jax.random.split(key, 4)

    # Shapes consistent with a segmentation head: (batch, channels, H, W).
    B, C, H, W = 2, 4, 16, 16
    logits = jax.random.normal(k1, (B, C, H, W), jnp.float32)
    targets = (jax.random.uniform(k2, (B, C, H, W)) > 0.5).astype(jnp.float32)

    loss = jax.block_until_ready(soft_dice_loss_pallas(logits, targets))
    ref = soft_dice_loss_ref(logits, targets)
    assert loss.shape == ()
    assert jnp.allclose(loss, ref, atol=1e-5, rtol=1e-5), (loss, ref)

    # Second check: flat size not a multiple of the tile exercises padding.
    logits2 = jax.random.normal(k3, (2, 3, 7, 5), jnp.float32)
    targets2 = (jax.random.uniform(k4, (2, 3, 7, 5)) > 0.5).astype(jnp.float32)
    loss2 = jax.block_until_ready(soft_dice_loss_pallas(logits2, targets2))
    ref2 = soft_dice_loss_ref(logits2, targets2)
    assert jnp.allclose(loss2, ref2, atol=1e-5, rtol=1e-5), (loss2, ref2)

    print("KERNEL_OK")
</pallas_src>

<mosaic_0001>
module attributes {stable_mosaic.version = 11 : i64} {
  func.func @_soft_dice_kernel(%arg0: i32, %arg1: i32, %arg2: memref<1x8x512xf32, #tpu.memory_space<vmem>>, %arg3: memref<1x8x512xf32, #tpu.memory_space<vmem>>, %arg4: memref<1x1xf32, #tpu.memory_space<vmem>>, %arg5: memref<1x1xf32, #tpu.memory_space<vmem>>, %arg6: memref<1x1xf32, #tpu.memory_space<vmem>>, %arg7: memref<1x1xf32, #tpu.memory_space<vmem>>, %arg8: memref<1x1xf32, #tpu.memory_space<vmem>>) attributes {dimension_semantics = [#tpu.dimension_semantics<arbitrary>, #tpu.dimension_semantics<arbitrary>], iteration_bounds = array<i64: 2, 1>, scalar_prefetch = 0 : i64, scratch_operands = 4 : i64, tpu.core_type = #tpu.core_type<tc>, window_params = [{transform_indices = @transform_0, window_bounds = array<i64: 1, 8, 512>}, {transform_indices = @transform_1, window_bounds = array<i64: 1, 8, 512>}, {pipeline_mode = #tpu.pipeline_mode<synchronous>, transform_indices = @transform_2, window_bounds = array<i64: 1, 1>}]} {
    %c0_i32 = arith.constant 0 : i32
    %0 = arith.cmpi eq, %arg0, %c0_i32 : i32
    %c0_i32_0 = arith.constant 0 : i32
    %1 = arith.cmpi eq, %arg1, %c0_i32_0 : i32
    %2 = arith.andi %0, %1 : i1
    %3 = arith.extui %2 : i1 to i32
    %c0_i32_1 = arith.constant 0 : i32
    %4 = arith.cmpi ne, %3, %c0_i32_1 : i32
    scf.if %4 {
      %cst_30 = arith.constant 0.000000e+00 : f32
      %52 = vector.broadcast %cst_30 : f32 to vector<1x1xf32>
      %c0_31 = arith.constant 0 : index
      %c0_32 = arith.constant 0 : index
      %53 = vector.load %arg8[%c0_31, %c0_32] : memref<1x1xf32, #tpu.memory_space<vmem>>, vector<1x1xf32>
      tpu.vector_store %arg8[%c0_31, %c0_32], %52 {strides = array<i32>} : memref<1x1xf32, #tpu.memory_space<vmem>>, vector<1x1xf32>,
    } else {
    }
    %c0_i32_2 = arith.constant 0 : i32
    %5 = arith.cmpi eq, %arg1, %c0_i32_2 : i32
    %6 = arith.extui %5 : i1 to i32
    %c0_i32_3 = arith.constant 0 : i32
    %7 = arith.cmpi ne, %6, %c0_i32_3 : i32
    scf.if %7 {
      %cst_30 = arith.constant 0.000000e+00 : f32
      %52 = vector.broadcast %cst_30 : f32 to vector<1x1xf32>
      %c0_31 = arith.constant 0 : index
      %c0_32 = arith.constant 0 : index
      %53 = vector.load %arg5[%c0_31, %c0_32] : memref<1x1xf32, #tpu.memory_space<vmem>>, vector<1x1xf32>
      tpu.vector_store %arg5[%c0_31, %c0_32], %52 {strides = array<i32>} : memref<1x1xf32, #tpu.memory_space<vmem>>, vector<1x1xf32>,
      %cst_33 = arith.constant 0.000000e+00 : f32
      %54 = vector.broadcast %cst_33 : f32 to vector<1x1xf32>
      %c0_34 = arith.constant 0 : index
      %c0_35 = arith.constant 0 : index
      %55 = vector.load %arg6[%c0_34, %c0_35] : memref<1x1xf32, #tpu.memory_space<vmem>>, vector<1x1xf32>
      tpu.vector_store %arg6[%c0_34, %c0_35], %54 {strides = array<i32>} : memref<1x1xf32, #tpu.memory_space<vmem>>, vector<1x1xf32>,
      %cst_36 = arith.constant 0.000000e+00 : f32
      %56 = vector.broadcast %cst_36 : f32 to vector<1x1xf32>
      %c0_37 = arith.constant 0 : index
      %c0_38 = arith.constant 0 : index
      %57 = vector.load %arg7[%c0_37, %c0_38] : memref<1x1xf32, #tpu.memory_space<vmem>>, vector<1x1xf32>
      tpu.vector_store %arg7[%c0_37, %c0_38], %56 {strides = array<i32>} : memref<1x1xf32, #tpu.memory_space<vmem>>, vector<1x1xf32>,
    } else {
    }
    %c0 = arith.constant 0 : index
    %c0_4 = arith.constant 0 : index
    %c0_5 = arith.constant 0 : index
    %8 = vector.load %arg2[%c0, %c0_4, %c0_5] : memref<1x8x512xf32, #tpu.memory_space<vmem>>, vector<1x8x512xf32>
    %9 = vector.shape_cast %8 : vector<1x8x512xf32> to vector<8x512xf32>
    %c0_6 = arith.constant 0 : index
    %c0_7 = arith.constant 0 : index
    %c0_8 = arith.constant 0 : index
    %10 = vector.load %arg3[%c0_6, %c0_7, %c0_8] : memref<1x8x512xf32, #tpu.memory_space<vmem>>, vector<1x8x512xf32>
    %11 = vector.shape_cast %10 : vector<1x8x512xf32> to vector<8x512xf32>
    %cst = arith.constant 5.000000e-01 : f32
    %12 = vector.broadcast %cst : f32 to vector<8x512xf32>
    %13 = arith.mulf %12, %9 : vector<8x512xf32>
    %14 = math.tanh %13 : vector<8x512xf32>
    %cst_9 = arith.constant 5.000000e-01 : f32
    %15 = vector.broadcast %cst_9 : f32 to vector<8x512xf32>
    %16 = arith.mulf %15, %14 : vector<8x512xf32>
    %cst_10 = arith.constant 5.000000e-01 : f32
    %17 = vector.broadcast %cst_10 : f32 to vector<8x512xf32>
    %18 = arith.addf %16, %17 : vector<8x512xf32>
    %c0_11 = arith.constant 0 : index
    %c0_12 = arith.constant 0 : index
    %19 = vector.load %arg5[%c0_11, %c0_12] : memref<1x1xf32, #tpu.memory_space<vmem>>, vector<1x1xf32>
    %20 = arith.mulf %18, %11 : vector<8x512xf32>
    %21 = vector.shape_cast %20 : vector<8x512xf32> to vector<1x8x512xf32>
    %cst_13 = arith.constant dense<0.000000e+00> : vector<1xf32>
    %22 = vector.multi_reduction <add>, %21, %cst_13 [1, 2] : vector<1x8x512xf32> to vector<1xf32>
    %23 = vector.shape_cast %22 : vector<1xf32> to vector<1x1x1xf32>
    %24 = vector.extract %23[0, 0, 0] : f32 from vector<1x1x1xf32>
    %25 = vector.broadcast %24 : f32 to vector<1x1xf32>
    %26 = arith.addf %19, %25 : vector<1x1xf32>
    %c0_14 = arith.constant 0 : index
    %c0_15 = arith.constant 0 : index
    %27 = vector.load %arg5[%c0_14, %c0_15] : memref<1x1xf32, #tpu.memory_space<vmem>>, vector<1x1xf32>
    tpu.vector_store %arg5[%c0_14, %c0_15], %26 {strides = array<i32>} : memref<1x1xf32, #tpu.memory_space<vmem>>, vector<1x1xf32>,
    %c0_16 = arith.constant 0 : index
    %c0_17 = arith.constant 0 : index
    %28 = vector.load %arg6[%c0_16, %c0_17] : memref<1x1xf32, #tpu.memory_space<vmem>>, vector<1x1xf32>
    %29 = vector.shape_cast %18 : vector<8x512xf32> to vector<1x8x512xf32>
    %cst_18 = arith.constant dense<0.000000e+00> : vector<1xf32>
    %30 = vector.multi_reduction <add>, %29, %cst_18 [1, 2] : vector<1x8x512xf32> to vector<1xf32>
    %31 = vector.shape_cast %30 : vector<1xf32> to vector<1x1x1xf32>
    %32 = vector.extract %31[0, 0, 0] : f32 from vector<1x1x1xf32>
    %33 = vector.broadcast %32 : f32 to vector<1x1xf32>
    %34 = arith.addf %28, %33 : vector<1x1xf32>
    %c0_19 = arith.constant 0 : index
    %c0_20 = arith.constant 0 : index
    %35 = vector.load %arg6[%c0_19, %c0_20] : memref<1x1xf32, #tpu.memory_space<vmem>>, vector<1x1xf32>
    tpu.vector_store %arg6[%c0_19, %c0_20], %34 {strides = array<i32>} : memref<1x1xf32, #tpu.memory_space<vmem>>, vector<1x1xf32>,
    %c0_21 = arith.constant 0 : index
    %c0_22 = arith.constant 0 : index
    %36 = vector.load %arg7[%c0_21, %c0_22] : memref<1x1xf32, #tpu.memory_space<vmem>>, vector<1x1xf32>
    %37 = vector.shape_cast %11 : vector<8x512xf32> to vector<1x8x512xf32>
    %cst_23 = arith.constant dense<0.000000e+00> : vector<1xf32>
    %38 = vector.multi_reduction <add>, %37, %cst_23 [1, 2] : vector<1x8x512xf32> to vector<1xf32>
    %39 = vector.shape_cast %38 : vector<1xf32> to vector<1x1x1xf32>
    %40 = vector.extract %39[0, 0, 0] : f32 from vector<1x1x1xf32>
    %41 = vector.broadcast %40 : f32 to vector<1x1xf32>
    %42 = arith.addf %36, %41 : vector<1x1xf32>
    %c0_24 = arith.constant 0 : index
    %c0_25 = arith.constant 0 : index
    %43 = vector.load %arg7[%c0_24, %c0_25] : memref<1x1xf32, #tpu.memory_space<vmem>>, vector<1x1xf32>
    tpu.vector_store %arg7[%c0_24, %c0_25], %42 {strides = array<i32>} : memref<1x1xf32, #tpu.memory_space<vmem>>, vector<1x1xf32>,
    %c0_i32_26 = arith.constant 0 : i32
    %44 = arith.cmpi eq, %arg1, %c0_i32_26 : i32
    %45 = arith.extui %44 : i1 to i32
    %c0_i32_27 = arith.constant 0 : i32
    %46 = arith.cmpi ne, %45, %c0_i32_27 : i32
    scf.if %46 {
      %c0_30 = arith.constant 0 : index
      %c0_31 = arith.constant 0 : index
      %52 = vector.load %arg5[%c0_30, %c0_31] : memref<1x1xf32, #tpu.memory_space<vmem>>, vector<1x1xf32>
      %cst_32 = arith.constant 1.000000e+00 : f32
      %53 = vector.broadcast %cst_32 : f32 to vector<1x1xf32>
      %54 = arith.addf %52, %53 : vector<1x1xf32>
      %cst_33 = arith.constant 2.000000e+00 : f32
      %55 = vector.broadcast %cst_33 : f32 to vector<1x1xf32>
      %56 = arith.mulf %55, %54 : vector<1x1xf32>
      %c0_34 = arith.constant 0 : index
      %c0_35 = arith.constant 0 : index
      %57 = vector.load %arg6[%c0_34, %c0_35] : memref<1x1xf32, #tpu.memory_space<vmem>>, vector<1x1xf32>
      %c0_36 = arith.constant 0 : index
      %c0_37 = arith.constant 0 : index
      %58 = vector.load %arg7[%c0_36, %c0_37] : memref<1x1xf32, #tpu.memory_space<vmem>>, vector<1x1xf32>
      %59 = arith.addf %57, %58 : vector<1x1xf32>
      %cst_38 = arith.constant 1.000000e+00 : f32
      %60 = vector.broadcast %cst_38 : f32 to vector<1x1xf32>
      %61 = arith.addf %59, %60 : vector<1x1xf32>
      %62 = arith.divf %56, %61 : vector<1x1xf32>
      %c0_39 = arith.constant 0 : index
      %c0_40 = arith.constant 0 : index
      %63 = vector.load %arg8[%c0_39, %c0_40] : memref<1x1xf32, #tpu.memory_space<vmem>>, vector<1x1xf32>
      %64 = arith.addf %63, %62 : vector<1x1xf32>
      %c0_41 = arith.constant 0 : index
      %c0_42 = arith.constant 0 : index
      %65 = vector.load %arg8[%c0_41, %c0_42] : memref<1x1xf32, #tpu.memory_space<vmem>>, vector<1x1xf32>
      tpu.vector_store %arg8[%c0_41, %c0_42], %64 {strides = array<i32>} : memref<1x1xf32, #tpu.memory_space<vmem>>, vector<1x1xf32>,
    } else {
    }
    %c1_i32 = arith.constant 1 : i32
    %47 = arith.cmpi eq, %arg0, %c1_i32 : i32
    %c0_i32_28 = arith.constant 0 : i32
    %48 = arith.cmpi eq, %arg1, %c0_i32_28 : i32
    %49 = arith.andi %47, %48 : i1
    %50 = arith.extui %49 : i1 to i32
    %c0_i32_29 = arith.constant 0 : i32
    %51 = arith.cmpi ne, %50, %c0_i32_29 : i32
    scf.if %51 {
      %c0_30 = arith.constant 0 : index
      %c0_31 = arith.constant 0 : index
      %52 = vector.load %arg8[%c0_30, %c0_31] : memref<1x1xf32, #tpu.memory_space<vmem>>, vector<1x1xf32>
      %cst_32 = arith.constant 5.000000e-01 : f32
      %53 = vector.broadcast %cst_32 : f32 to vector<1x1xf32>
      %54 = arith.mulf %52, %53 : vector<1x1xf32>
      %cst_33 = arith.constant 1.000000e+00 : f32
      %55 = vector.broadcast %cst_33 : f32 to vector<1x1xf32>
      %56 = arith.subf %55, %54 : vector<1x1xf32>
      %c0_34 = arith.constant 0 : index
      %c0_35 = arith.constant 0 : index
      %57 = vector.load %arg4[%c0_34, %c0_35] : memref<1x1xf32, #tpu.memory_space<vmem>>, vector<1x1xf32>
      tpu.vector_store %arg4[%c0_34, %c0_35], %56 {strides = array<i32>} : memref<1x1xf32, #tpu.memory_space<vmem>>, vector<1x1xf32>,
    } else {
    }
    return
  }
  func.func @transform_0(%arg0: i32, %arg1: i32) -> (i32, i32, i32) {
    %c0_i32 = arith.constant 0 : i32
    %c0_i32_0 = arith.constant 0 : i32
    return %arg0, %arg1, %c0_i32 : i32, i32, i32
  }
  func.func @transform_1(%arg0: i32, %arg1: i32) -> (i32, i32, i32) {
    %c0_i32 = arith.constant 0 : i32
    %c0_i32_0 = arith.constant 0 : i32
    return %arg0, %arg1, %c0_i32 : i32, i32, i32
  }
  func.func @transform_2(%arg0: i32, %arg1: i32) -> (i32, i32) {
    %c0_i32 = arith.constant 0 : i32
    %c0_i32_0 = arith.constant 0 : i32
    %c0_i32_1 = arith.constant 0 : i32
    return %c0_i32, %c0_i32_0 : i32, i32
  }
}

</mosaic_0001>

<bundles_post_ra>
// kernel: tpu_custom_call.1
= control target key start
LH: loop header
LB: loop body
LE: loop exit
PB: predicated region body
PF: predicated region fallthrough
CT: control target
= control target key end

     0   :  { %7 = vsyncpa [#allocation7], 0  ;;  %s836_s0 = inlined_call_operand.hbm [shape: f32[2,8,512], index: 0, kind: input, shape index: {}]   ;;  %s837_s1 = inlined_call_operand.hbm [shape: f32[2,8,512], index: 1, kind: input, shape index: {}]   ;;  %s838_s2 = inlined_call_operand.hbm [shape: f32[1,1], index: 2, kind: output, shape index: {}]  }
   0x1   :  { %9 = vsyncpa [#allocation7 + $0x1], 0 }
   0x2   :  { %10 = vsyncpa [#allocation10], 0 }
   0x3   :  { %12 = vsyncpa [#allocation10 + $0x1], 0 }
   0x4   :  { %13 = vsyncpa [#allocation8], 0  ;;  %s684_s9 = smov 0   ;;  %s686_s10 = smov 0  }
   0x5   :  { %s688_s11 = smov 0   ;;  %s690_s12 = smov 0  }
   0x6   :  { %s692_s13 = smov 0   ;;  %s694_s14 = smov 0  }
   0x7 LB: > { %s417_s15 = sadd.s32 4294967295, %s662_s14   ;;  %s31_s16 = sadd.s32 1, %s658_s13  ;;  %s662_s14 = sphi %s694_s14, %s19_s14   ;;  %s658_s13 = sphi %s692_s13, %s848_s13   ;;  %s654_s12 = sphi %s690_s12, %s847_s12   ;;  %s650_s11 = sphi %s688_s11, %s846_s11   ;;  %s646_s10 = sphi %s686_s10, %s845_s10   ;;  %s642_s9 = sphi %s684_s9, %s844_s9  }
   0x8   : > { %p33_p0 = scmp.ge.s32.totalorder %s31_s16, 2  ;;  %s40_s17 = sadd.s32 1, %s650_s11 }
   0x9   : > { %p47_p1 = scmp.ne.s32.totalorder %s650_s11, %s646_s10  ;;  %p48_p2 = scmp.eq.s32.totalorder %s662_s14, 0 }
   0xa   : > { %s850_s16 = smov (%p33_p0, %s31_s16), 0  ;;  %p53_p4 = scmp.ne.s32.totalorder %s646_s10, %s642_s9 }
   0xb   : > { %p720_p3 = por %p48_p2, %p47_p1  ;;  %s35_s19 = ssub.s32 %s658_s13, %s850_s16 }
   0xc   : > { %p54_p5 = scmp.eq.s32.totalorder %s417_s15, 0  ;;  %p38_p6 = scmp.eq.s32.totalorder %s35_s19, 0 }
   0xd   : > { %p460_p8 = scmp.lt.s32.totalorder %s662_s14, 2  ;;  %s738_s22 = sand.u32 1, %s650_s11  }
   0xe   : > { %p729_p7 = por %p54_p5, %p53_p4  ;;  %s435_s23 = sshll.u32 %s658_s13, 9 }
   0xf   : > { %s735_s21 = scalar_select %p38_p6, %s650_s11, %s40_s17  }
  0x10   : > { %s420_s24 = sshll.u32 %s738_s22, 5  ;;  %s138_s27 = scalar_lea.hbm %s836_s0, %s435_s23 }
  0x11   : > { %s130_s28 = scalar_lea.vmem [#allocation6], %s420_s24  ;;  %p747_p9 = pnand %p460_p8, %p720_p3 }
  0x12   : > { %s140_s29 = sshll.u32 %s130_s28, 4  ;;  %p426_p10 = scmp.ge.s32.totalorder %s662_s14, 1  ;;  %s141_s29 = int_to_ptr.vmem [resolvable:$true] %s140_s29 }
  0x13   : > { %p166_p11 = scmp.lt.s32.totalorder %s662_s14, 3  ;;  %s127_s3 = scalar_lea.sflag [#allocation7], %s738_s22 }
  0x14   : > { %p526_p12 = pneg %p747_p9  ;;  %s537_s4 = scalar_lea.vmem %s141_s29, 512 }
  0x15   : > { %p538_p13 = scmp.ne.s32.totalorder %s141_s29, %s537_s4  ;;  %s664_s5 = smov [#allocation6]  }
  0x16   : > { %s542_s6 = sshll.u32 %s664_s5, 4  ;;  %s543_s6 = int_to_ptr.vmem [resolvable:$false] %s542_s6 }
  0x17   : > { %p540_p0 = pnand %p538_p13, %p526_p12  ;;  %s544_s7 = scalar_lea.vmem %s543_s6, 1024 }
  0x18   : > { %p545_p2 = scmp.lt.s32.totalorder %s141_s29, %s543_s6  ;;  %p546_p3 = scmp.lt.s32.totalorder %s544_s7, %s537_s4 }
  0x19   : > { %p541_p1 = pneg %p540_p0 }
  0x1a   : > { %p547_p4 = por %p546_p3, %p545_p2 }
  0x1c   : > { %p548_p5 = pnand %p547_p4, %p541_p1 }
  0x1e   : > { %551 = shalt.err (!%p548_p5)
}
  0x1f   : > { %456 = dma.hbm_to_vmem [thread:$0]  (!%p747_p9), %s138_s27, 512, %s141_s29, %s127_s3  }
  0x20   : > { %p765_p6 = pnand %p426_p10, %p166_p11  ;;  %s159_s18 = scalar_lea.hbm %s837_s1, %s435_s23 }
  0x21   : > { %s151_s19 = scalar_lea.vmem [#allocation9], %s420_s24  ;;  %s148_s26 = scalar_lea.sflag [#allocation10], %s738_s22 }
  0x22   : > { %s161_s25 = sshll.u32 %s151_s19, 4  ;;  %s665_s27 = smov [#allocation9]   ;;  %s162_s25 = int_to_ptr.vmem [resolvable:$true] %s161_s25 }
  0x23   : > { %s565_s28 = scalar_lea.vmem %s162_s25, 512  ;;  %s570_s29 = sshll.u32 %s665_s27, 4  ;;  %s571_s29 = int_to_ptr.vmem [resolvable:$false] %s570_s29 }
  0x24   : > { %p566_p8 = scmp.ne.s32.totalorder %s162_s25, %s565_s28  ;;  %s572_s3 = scalar_lea.vmem %s571_s29, 1024 }
  0x25   : > { %p573_p10 = scmp.lt.s32.totalorder %s162_s25, %s571_s29  ;;  %p574_p11 = scmp.lt.s32.totalorder %s572_s3, %s565_s28 }
  0x26   : > { %p568_p13 = pnand %p566_p8, %p526_p12 }
  0x27   : > { %p575_p1 = por %p574_p11, %p573_p10 }
  0x28   : > { %p569_p0 = pneg %p568_p13 }
  0x2a   : > { %p576_p2 = pnand %p575_p1, %p569_p0 }
  0x2c   : > { %579 = shalt.err (!%p576_p2)
}
  0x2d   : > { %459 = dma.hbm_to_vmem [thread:$0]  (!%p747_p9), %s159_s18, 512, %s162_s25, %s148_s26  }
  0x2e   : > { %170 = sbr.rel (%p765_p6) target bundleno = 358 (0x166), region = 28  ;;  %s172_s22 = sand.u32 (!%p765_p6), 1, %s646_s10  }
  0x2f   : > { %s427_s23 = sshll.u32 (!%p765_p6), %s172_s22, 5  ;;  %s173_s24 = scalar_lea.sflag (!%p765_p6), [#allocation7], %s172_s22 }
  0x30   : > { %s176_s4 = scalar_lea.vmem (!%p765_p6), [#allocation6], %s427_s23 }
  0x33   : > { %629 = dma.done.wait (%p729_p7), %s173_s24, 512  }
  0x34   : > { %631 = vsyncadd (%p729_p7), %s173_s24, 4294966784  ;;  %s182_s5 = scalar_lea.sflag [#allocation10], %s172_s22  ;;  %s185_s6 = scalar_lea.vmem [#allocation9], %s427_s23 }
  0x35   : > { %633 = dma.done.wait (%p729_p7), %s182_s5, 512  }
  0x36   : > { %635 = vsyncadd (%p729_p7), %s182_s5, 4294966784  ;;  %p206_p9 = scmp.eq.s32.totalorder %s654_s12, 0 }
  0x37   : > { %vm212_vm0 = vcmask (%p206_p9), 0   ;;  %v666_v0 = vmov (%p206_p9), 0.0  }
  0x38   : > { %211 = sbr.rel (!%p206_p9) target bundleno = 61 (0x3d), region = 40  ;;  %213 = vst.msk [vmem:[#allocation5] sm:$0x1] (%p206_p9), %vm212_vm0, %v666_v0 }
  0x3d PF: > { %v225_v1 = vld [vmem:[%s185_s6] sm:$0xff]  ;;  %v226_v2 = vld [vmem:[%s185_s6 + $0x8] sm:$0xff]  ;;  %v227_v3 = vld [vmem:[%s185_s6 + $0x10] sm:$0xff]  ;;  %vm217_vm1 = vcmask 0   ;;  %v667_v38 = vmov 0.0   ;;  %p313_p7 = scmp.eq.s32.totalorder %s654_s12, 1 }
  0x3e   : > { %v283_v4 = vadd.f32 %v226_v2, %v225_v1  ;;  %v221_v5 = vld [vmem:[%s176_s4] sm:$0xff]  ;;  %v222_v6 = vld [vmem:[%s176_s4 + $0x8] sm:$0xff]  ;;  %v228_v7 = vld [vmem:[%s185_s6 + $0x18] sm:$0xff]  ;;  %218 = vst.msk [vmem:[#allocation2] sm:$0x1] %vm217_vm1, %v667_v38 }
  0x3f   : > { %v223_v8 = vld [vmem:[%s176_s4 + $0x10] sm:$0xff]  ;;  %v224_v9 = vld [vmem:[%s176_s4 + $0x18] sm:$0xff]  ;;  %v229_v10 = vmul.f32 0.5, %v221_v5  ;;  %v230_v11 = vmul.f32 0.5, %v222_v6  ;;  %219 = vst.msk [vmem:[#allocation3] sm:$0x1] %vm217_vm1, %v667_v38 }
  0x40   : > { %v284_v12 = vadd.f32 %v283_v4, %v227_v3  ;;  %v231_v13 = vmul.f32 0.5, %v223_v8  ;;  %v232_v14 = vmul.f32 0.5, %v224_v9  ;;  %220 = vst.msk [vmem:[#allocation4] sm:$0x1] %vm217_vm1, %v667_v38 }
  0x41   : > { %514 = vtanh.f32 %v229_v10 }
  0x42   : > { %v285_v15 = vadd.f32 %v284_v12, %v228_v7  ;;  %516 = vtanh.f32 %v230_v11 }
  0x43   : > { %518 = vtanh.f32 %v231_v13  ;;  %v310_v13 = vld [vmem:[#allocation5] sm:$0x1] }
  0x44   : > { %286 = vadd.xlane.f32.xlu1 %v285_v15  ;;  %520 = vtanh.f32 %v232_v14 }
  0x45   : > { %v245_v60 = vld [vmem:[#allocation2] sm:$0x1] }
  0x46   : > { %v266_v63 = vld [vmem:[#allocation3] sm:$0x1] }
  0x47   : > { %v282_v0 = vld [vmem:[#allocation4] sm:$0x1] }
  0x4e   : > { %v515_v16 = vpop.eup %514 }
  0x4f   : > { %v517_v17 = vpop.eup %516  ;;  %v237_v18 = vmul.f32 0.5, %v515_v16 }
  0x50   : > { %v519_v19 = vpop.eup %518  ;;  %v238_v20 = vmul.f32 0.5, %v517_v17 }
  0x51   : > { %v521_v21 = vpop.eup %520  ;;  %v239_v22 = vmul.f32 0.5, %v519_v19  ;;  %v241_v23 = vadd.f32 0.5, %v237_v18 }
  0x52   : > { %v240_v24 = vmul.f32 0.5, %v521_v21  ;;  %v242_v25 = vadd.f32 0.5, %v238_v20 }
  0x53   : > { %v243_v26 = vadd.f32 0.5, %v239_v22  ;;  %v246_v27 = vmul.f32 %v241_v23, %v225_v1 }
  0x54   : > { %v244_v28 = vadd.f32 0.5, %v240_v24  ;;  %v247_v29 = vmul.f32 %v242_v25, %v226_v2  ;;  %v267_v30 = vadd.f32 %v242_v25, %v241_v23 }
  0x55   : > { %v248_v31 = vmul.f32 %v243_v26, %v227_v3 }
  0x56   : > { %v249_v32 = vmul.f32 %v244_v28, %v228_v7  ;;  %v250_v33 = vadd.f32 %v247_v29, %v246_v27  ;;  %v268_v35 = vadd.f32 %v267_v30, %v243_v26 }
  0x58   : > { %v251_v34 = vadd.f32 %v250_v33, %v248_v31  ;;  %v269_v37 = vadd.f32 %v268_v35, %v244_v28 }
  0x5a   : > { %v252_v36 = vadd.f32 %v251_v34, %v249_v32 }
  0x5c   : > { %253 = vadd.xlane.f32.xlu0 %v252_v36 }
  0x60   : > { %270 = vadd.xlane.f32.xlu0 %v269_v37 }
  0xcd   : > { %v287_v39 = vpop.xlane.xlu1 %286 }
  0xce   : > { %v288_v40 = vrot.slane %v287_v39, 4 }
  0xd0   : > { %v289_v41 = vadd.f32 %v288_v40, %v287_v39 }
  0xd2   : > { %v290_v45 = vrot.slane %v289_v41, 2 }
  0xd4   : > { %v291_v51 = vadd.f32 %v290_v45, %v289_v41 }
  0xd6   : > { %v292_v56 = vrot.slane %v291_v51, 1 }
  0xd8   : > { %v293_v59 = vadd.f32 %v292_v56, %v291_v51 }
  0xe5   : > { %v254_v42 = vpop.xlane.xlu0 %253 }
  0xe6   : > { %v255_v43 = vrot.slane %v254_v42, 4 }
  0xe8   : > { %v256_v44 = vadd.f32 %v255_v43, %v254_v42 }
  0xe9   : > { %v271_v46 = vpop.xlane.xlu0 %270 }
  0xea   : > { %v257_v47 = vrot.slane %v256_v44, 2  ;;  %v272_v48 = vrot.slane %v271_v46, 4 }
  0xec   : > { %v273_v49 = vadd.f32 %v272_v48, %v271_v46  ;;  %v258_v50 = vadd.f32 %v257_v47, %v256_v44 }
  0xee   : > { %v274_v52 = vrot.slane %v273_v49, 2  ;;  %v259_v53 = vrot.slane %v258_v50, 1 }
  0xf0   : > { %v275_v54 = vadd.f32 %v274_v52, %v273_v49  ;;  %v260_v55 = vadd.f32 %v259_v53, %v258_v50 }
  0xf2   : > { %439 = vpush %v260_v55  ;;  %v276_v57 = vrot.slane %v275_v54, 1 }
  0xf4   : > { %v277_v58 = vadd.f32 %v276_v57, %v275_v54 }
  0xf6   : > { %441 = vpush %v277_v58 }
  0xf7   : > { %443 = vpush %v293_v59 }
 0x123   : > { %s440_s20 = spop %439 }
 0x124   : > { %v262_v61 = vstv %s440_s20 }
 0x125   : > { %v263_v62 = vadd.f32 %v262_v61, %v245_v60 }
 0x127   : > { %265 = vst.msk [vmem:[#allocation2] sm:$0x1] %vm217_vm1, %v263_v62  ;;  %s442_s30 = spop %441 }
 0x128   : > { %v279_v1 = vstv %s442_s30  ;;  %s444_s7 = spop %443 }
 0x129   : > { %v280_v2 = vadd.f32 %v279_v1, %v266_v63  ;;  %v295_v3 = vstv %s444_s7 }
 0x12a   : > { %v296_v4 = vadd.f32 %v295_v3, %v282_v0 }
 0x12b   : > { %281 = vst.msk [vmem:[#allocation3] sm:$0x1] %vm217_vm1, %v280_v2 }
 0x12c   : > { %297 = vst.msk [vmem:[#allocation4] sm:$0x1] %vm217_vm1, %v296_v4 }
 0x12e   : > { %v301_v9 = vld [vmem:[#allocation2] sm:$0x1] }
 0x12f   : > { %v302_v10 = vadd.f32 1.0, %v301_v9 }
 0x131   : > { %v303_v11 = vmul.f32 2.0, %v302_v10 }
 0x132   : > { %v304_v5 = vld [vmem:[#allocation3] sm:$0x1] }
 0x133   : > { %v305_v6 = vld [vmem:[#allocation4] sm:$0x1] }
 0x134   : > { %v306_v7 = vadd.f32 %v305_v6, %v304_v5 }
 0x136   : > { %v307_v8 = vadd.f32 1.0, %v306_v7 }
 0x138   : > { %522 = vrcp.f32 %v307_v8 }
 0x145   : > { %v523_v12 = vpop.eup %522 }
 0x146   : > { %v309_v14 = vmul.f32 %v523_v12, %v303_v11  ;;  %317 = sbr.rel (!%p313_p7) target bundleno = 343 (0x157), region = 52 }
 0x148   : > { %v311_v15 = vadd.f32 %v310_v13, %v309_v14 }
 0x14a   : > { %312 = vst.msk [vmem:[#allocation5] sm:$0x1] %vm217_vm1, %v311_v15 }
 0x151   : > { %v318_v16 = vld [vmem:[#allocation5] sm:$0x1] }
 0x152   : > { %v319_v17 = vmul.f32 0.5, %v318_v16 }
 0x154   : > { %v320_v18 = vsub.f32 1.0, %v319_v17 }
 0x156   : > { %321 = vst.msk [vmem:[#allocation11] sm:$0x1] %vm217_vm1, %v320_v18 }
 0x157 PF: > { %p803_p12 = scmp.eq.s32.totalorder %s417_s15, 1  ;;  %s668_s9 = smov [#allocation11]  }
 0x158   : > { %s329_s17 = sshll.u32 %s668_s9, 4  ;;  %s330_s17 = int_to_ptr.vmem [resolvable:$true] %s329_s17 }
 0x159   : > { %s580_s18 = scalar_lea.vmem %s330_s17, 16  ;;  %s586_s12 = scalar_lea.vmem %s330_s17, 32 }
 0x15a   : > { %p581_p3 = scmp.ne.s32.totalorder %s330_s17, %s580_s18  ;;  %p587_p6 = scmp.lt.s32.totalorder %s330_s17, %s330_s17 }
 0x15b   : > { %p588_p8 = scmp.lt.s32.totalorder %s586_s12, %s580_s18 }
 0x15c   : > { %p582_p4 = pnand %p581_p3, %p803_p12 }
 0x15d   : > { %p589_p13 = por %p588_p8, %p587_p6 }
 0x15e   : > { %p583_p5 = pneg %p582_p4 }
 0x160   : > { %p590_p0 = pnand %p589_p13, %p583_p5 }
 0x162   : > { %593 = shalt.err (!%p590_p0)
}
 0x163   : > { %450 = dma.vmem_to_hbm [thread:$0]  (%p803_p12), %s330_s17, 16, %s838_s2, [#allocation8]  }
 0x164   : > { %637 = dma.done.wait (%p803_p12), [#allocation8], 16  }
 0x165   : > { %639 = vsyncadd (%p803_p12), [#allocation8], 4294967280 }
 0x166 PF: > { %s19_s14 = sadd.s32 1, %s662_s14   ;;  %s844_s9 = smov %s646_s10 }
 0x167   : > { %p16_p10 = scmp.ge.s32.totalorder %s19_s14, 4   ;;  %s845_s10 = smov %s650_s11 }
 0x168   : > { %s846_s11 = smov %s735_s21  ;;  %s847_s12 = smov %s658_s13 }
 0x169   : > { %s848_s13 = smov %s850_s16  ;;  %18 = sbr.rel (!%p16_p10) target bundleno = 7 (0x7), region = 94 }
 0x16e   :  { %342 = vsyncpa [#allocation7], 1 }
 0x16f   :  { %344 = vsyncpa [#allocation7 + $0x1], 1 }
 0x170   :  { %345 = vsyncpa [#allocation10], 1 }
 0x171   :  { %347 = vsyncpa [#allocation10 + $0x1], 1 }
 0x172   :  { %348 = vsyncpa [#allocation8], 1 }
 0x173   :  { %350 = vsyncpa [#allocation8 + $0x1], 1 }

</bundles_post_ra>
